<compile_context>
chip_gen: v6e
topology: v6e:2x2x1
jax: 0.10.0
libtpu: 0.0.40
codegen_flags: <defaults>
</compile_context>

<pallas_src>
import functools

import jax
import jax.numpy as jnp
from jax.experimental import pallas as pl
from jax.experimental.pallas import tpu as pltpu


def _round_up(x, m):
    return (x + m - 1) // m * m


def _cdiv(a, b):
    return -(-a // b)


def _vmem_budget_bytes():
    """75% of the physical per-core VMEM (headroom for Mosaic scratch)."""
    try:
        cap = int(pltpu.get_tpu_info().vmem_capacity_bytes)
    except Exception:
        cap = 64 << 20  # conservative (v7x-sized) fallback
    return (cap * 3) // 4


def _pad2d(a, rows, cols, dtype):
    """Zero-pad/cast `a` to (rows, cols, dtype); no-op copy when already aligned."""
    dtype = jnp.dtype(dtype)
    if a.shape == (rows, cols) and a.dtype == dtype:
        return a
    out = jnp.zeros((rows, cols), dtype)
    return out.at[: a.shape[0], : a.shape[1]].set(a.astype(dtype))


# --------------------------------------------------------------------------
# Kernels
# --------------------------------------------------------------------------
def _ffn_resident_kernel(x_ref, w1_ref, b1_ref, w2_ref, b2_ref, o_ref):
    # Weights/biases are full-extent & constant-index (resident in VMEM).
    # x_ref:(tm,d_in) w1:(d_in,d_h) b1:(1,d_h) w2:(d_h,d_out) b2:(1,d_out)
    h = jnp.dot(x_ref[...], w1_ref[...], preferred_element_type=jnp.float32)
    h = jnp.maximum(h + b1_ref[...], 0.0)
    o = jnp.dot(h.astype(w2_ref.dtype), w2_ref[...],
                preferred_element_type=jnp.float32)
    o_ref[...] = (o + b2_ref[...]).astype(o_ref.dtype)


def _ffn_tiled_kernel_acc_out(x_ref, w1_ref, b1_ref, w2_ref, b2_ref, o_ref):
    # Streamed-weights schedule, f32 output: accumulate directly into o_ref
    # (the output block is resident across the hidden axis).
    k = pl.program_id(1)

    @pl.when(k == 0)
    def _():
        o_ref[...] = jnp.broadcast_to(b2_ref[...], o_ref.shape)

    h = jnp.dot(x_ref[...], w1_ref[...], preferred_element_type=jnp.float32)
    h = jnp.maximum(h + b1_ref[...], 0.0)
    o_ref[...] += jnp.dot(h.astype(w2_ref.dtype), w2_ref[...],
                          preferred_element_type=jnp.float32)


def _ffn_tiled_kernel_scratch(x_ref, w1_ref, b1_ref, w2_ref, b2_ref, o_ref,
                              acc_ref):
    # Streamed-weights schedule, narrow output dtype: f32 VMEM accumulator.
    k = pl.program_id(1)

    @pl.when(k == 0)
    def _():
        acc_ref[...] = jnp.zeros_like(acc_ref)

    h = jnp.dot(x_ref[...], w1_ref[...], preferred_element_type=jnp.float32)
    h = jnp.maximum(h + b1_ref[...], 0.0)
    acc_ref[...] += jnp.dot(h.astype(w2_ref.dtype), w2_ref[...],
                            preferred_element_type=jnp.float32)

    @pl.when(k == pl.num_programs(1) - 1)
    def _():
        o_ref[...] = (acc_ref[...] + b2_ref[...]).astype(o_ref.dtype)


# --------------------------------------------------------------------------
# Wrapper
# --------------------------------------------------------------------------
@functools.partial(jax.jit, static_argnames=("compute_dtype", "force_tiled"))
def position_wise_ffn(x, w1, b1, w2, b2, *, compute_dtype=None,
                      force_tiled=False):
    """x: (..., d_in) -> (..., d_out), computed as dense2(relu(dense1(x))).

    Weights are stored (in_features, out_features) (torch Linear weight,
    transposed), so the kernel computes x @ W + b.  `compute_dtype=bfloat16`
    is the fast path on every TPU generation (bf16 MXU operands, f32
    accumulation, f32 biases); the default f32 path is bit-faithful to the
    PyTorch module but slower and heavier on HBM.
    """
    out_dtype = x.dtype
    compute_dtype = jnp.dtype(out_dtype if compute_dtype is None else compute_dtype)
    itemsize = compute_dtype.itemsize
    out_itemsize = jnp.dtype(out_dtype).itemsize

    d_in, d_h, d_out = x.shape[-1], w1.shape[1], w2.shape[1]
    x2d = x.reshape(-1, d_in)
    m = x2d.shape[0]

    # Lane-dense feature axes (multiples of 128) -> unmasked MXU ops & stores.
    d_in_p = _round_up(d_in, 128)
    d_h_p = _round_up(d_h, 128)
    d_out_p = _round_up(d_out, 128)

    sub = 16 if itemsize == 2 else 8                 # sublane packing
    tm_target = 1024 if itemsize == 2 else 512       # big tiles: weight reuse

    # Row tile: divide m as evenly as possible (minimal padded rows), then
    # guarantee >= 2 row tiles when possible so the "parallel" axis can be
    # sharded across both TensorCores on dual-core parts (v7x).
    n_tiles = max(1, _cdiv(m, tm_target))
    tm = _round_up(_cdiv(m, n_tiles), sub)
    if _cdiv(m, tm) == 1 and tm >= 2 * sub:
        tm = _round_up(_cdiv(tm, 2), sub)

    budget = _vmem_budget_bytes()

    def resident_fp(tm_):
        # Conservative: double-buffered everything + f32 intermediates.
        return (2 * (d_in_p * d_h_p + d_h_p * d_out_p) * itemsize   # w1, w2
                + 2 * (d_h_p + d_out_p) * 4                         # biases
                + 2 * tm_ * d_in_p * itemsize                       # x tile
                + 2 * tm_ * d_out_p * out_itemsize                  # out tile
                + tm_ * d_h_p * (4 + itemsize)                      # h (+cast)
                + tm_ * d_out_p * 4)                                # f32 result

    def tiled_fp(tm_, th_, scratch):
        return (2 * tm_ * d_in_p * itemsize
                + 2 * (d_in_p * th_ + th_ * d_out_p) * itemsize
                + 2 * (th_ + d_out_p) * 4
                + 2 * tm_ * d_out_p * out_itemsize
                + tm_ * th_ * (4 + itemsize)
                + tm_ * d_out_p * 4
                + (tm_ * d_out_p * 4 if scratch else 0))

    # ---- prefer the resident-weights schedule (weights DMA'd once) ----
    tm_res = tm
    while tm_res > sub and resident_fp(tm_res) > budget:
        tm_res = max(sub, _round_up(tm_res // 2, sub))
    use_resident = (not force_tiled) and resident_fp(tm_res) <= budget

    if use_resident:
        tm = tm_res
        th = d_h_p
    else:
        # Hidden-axis chunk: largest of {512, 384, 256, 128} dividing d_h_p
        # (keeps the MXU shape and avoids dead hidden columns).
        th = 128
        for cand in (512, 384, 256):
            if d_h_p % cand == 0:
                th = cand
                break
        acc_in_out = jnp.dtype(out_dtype) == jnp.dtype(jnp.float32)
        while tm > sub and tiled_fp(tm, th, not acc_in_out) > budget:
            tm = max(sub, _round_up(tm // 2, sub))
        if tiled_fp(tm, th, not acc_in_out) > budget:
            th = 128  # last resort: smallest lane-aligned hidden chunk

    m_pad = _round_up(m, tm)

    # ---- zero padding keeps the math exact (padded cols contribute 0);
    #      skipped entirely when already aligned & in the compute dtype ----
    xp = _pad2d(x2d, m_pad, d_in_p, compute_dtype)
    w1p = _pad2d(w1, d_in_p, d_h_p, compute_dtype)
    w2p = _pad2d(w2, d_h_p, d_out_p, compute_dtype)
    b1p = _pad2d(b1.reshape(1, -1), 1, d_h_p, jnp.float32)   # f32 biases:
    b2p = _pad2d(b2.reshape(1, -1), 1, d_out_p, jnp.float32)  # no double rounding

    n_row_tiles = m_pad // tm
    weight_bytes = (w1p.size + w2p.size) * itemsize + (b1p.size + b2p.size) * 4
    streamed_weight_bytes = weight_bytes if use_resident else n_row_tiles * weight_bytes
    cost = pl.CostEstimate(
        flops=2 * m_pad * (d_in_p * d_h_p + d_h_p * d_out_p),
        transcendentals=0,
        bytes_accessed=(xp.size * itemsize + streamed_weight_bytes
                        + m_pad * d_out_p * out_itemsize),
    )

    if use_resident:
        out2d = pl.pallas_call(
            _ffn_resident_kernel,
            out_shape=jax.ShapeDtypeStruct((m_pad, d_out_p), out_dtype),
            grid_spec=pltpu.PrefetchScalarGridSpec(
                num_scalar_prefetch=0,
                grid=(n_row_tiles,),
                in_specs=[
                    pl.BlockSpec((tm, d_in_p), lambda i: (i, 0)),      # x rows
                    pl.BlockSpec((d_in_p, d_h_p), lambda i: (0, 0)),   # w1 (resident)
                    pl.BlockSpec((1, d_h_p), lambda i: (0, 0)),        # b1 (f32)
                    pl.BlockSpec((d_h_p, d_out_p), lambda i: (0, 0)),  # w2 (resident)
                    pl.BlockSpec((1, d_out_p), lambda i: (0, 0)),      # b2 (f32)
                ],
                out_specs=pl.BlockSpec((tm, d_out_p), lambda i: (i, 0)),
            ),
            compiler_params=pltpu.CompilerParams(
                dimension_semantics=("parallel",),
                vmem_limit_bytes=int(budget)),
            cost_estimate=cost,
        )(xp, w1p, b1p, w2p, b2p)
    else:
        acc_in_out = jnp.dtype(out_dtype) == jnp.dtype(jnp.float32)
        kernel = _ffn_tiled_kernel_acc_out if acc_in_out else _ffn_tiled_kernel_scratch
        scratch = () if acc_in_out else (pltpu.VMEM((tm, d_out_p), jnp.float32),)
        out2d = pl.pallas_call(
            kernel,
            out_shape=jax.ShapeDtypeStruct((m_pad, d_out_p), out_dtype),
            grid_spec=pltpu.PrefetchScalarGridSpec(
                num_scalar_prefetch=0,
                grid=(n_row_tiles, d_h_p // th),
                in_specs=[
                    pl.BlockSpec((tm, d_in_p), lambda i, k: (i, 0)),   # x rows
                    pl.BlockSpec((d_in_p, th), lambda i, k: (0, k)),   # w1 slice
                    pl.BlockSpec((1, th), lambda i, k: (0, k)),        # b1 slice
                    pl.BlockSpec((th, d_out_p), lambda i, k: (k, 0)),  # w2 slice
                    pl.BlockSpec((1, d_out_p), lambda i, k: (0, 0)),   # b2
                ],
                out_specs=pl.BlockSpec((tm, d_out_p), lambda i, k: (i, 0)),
                scratch_shapes=list(scratch),
            ),
            compiler_params=pltpu.CompilerParams(
                dimension_semantics=("parallel", "arbitrary"),
                vmem_limit_bytes=int(budget)),
            cost_estimate=cost,
        )(xp, w1p, b1p, w2p, b2p)

    return out2d[:m, :d_out].reshape(*x.shape[:-1], d_out)


def _init_linear_params(key, in_features, out_features, dtype=jnp.float32):
    """torch.nn.Linear-style init; weight returned as (in, out) = torch weight.T."""
    k_w, k_b = jax.random.split(key)
    bound = 1.0 / (in_features ** 0.5)
    w = jax.random.uniform(k_w, (in_features, out_features), dtype,
                           minval=-bound, maxval=bound)
    b = jax.random.uniform(k_b, (out_features,), dtype,
                           minval=-bound, maxval=bound)
    return w, b


if __name__ == "__main__":
    # Small shapes consistent with the module: batch=2, seq=8,
    # ffn_num_inputs=32, ffn_num_hiddens=64, ffn_num_outputs=32.
    batch, seq = 2, 8
    ffn_num_inputs, ffn_num_hiddens, ffn_num_outputs = 32, 64, 32

    key = jax.random.PRNGKey(0)
    k_x, k_l1, k_l2 = jax.random.split(key, 3)

    x = jax.random.normal(k_x, (batch, seq, ffn_num_inputs), jnp.float32)
    w1, b1 = _init_linear_params(k_l1, ffn_num_inputs, ffn_num_hiddens)
    w2, b2 = _init_linear_params(k_l2, ffn_num_hiddens, ffn_num_outputs)

    # High-precision reference (same math as the PyTorch module).
    h_ref = jnp.maximum(
        jnp.dot(x, w1, precision=jax.lax.Precision.HIGHEST) + b1, 0.0)
    ref = jnp.dot(h_ref, w2, precision=jax.lax.Precision.HIGHEST) + b2

    # 1) f32, resident-weights schedule (default for small models).
    out = jax.block_until_ready(position_wise_ffn(x, w1, b1, w2, b2))
    assert out.shape == (batch, seq, ffn_num_outputs)
    assert jnp.allclose(out, ref, atol=1e-3, rtol=1e-3), "f32 resident mismatch"

    # 2) bf16 operands / f32 accumulation (fast path on v5e/v6e/v7x MXUs).
    out_bf16 = jax.block_until_ready(
        position_wise_ffn(x, w1, b1, w2, b2, compute_dtype=jnp.bfloat16))
    assert out_bf16.shape == (batch, seq, ffn_num_outputs)
    assert jnp.allclose(out_bf16, ref, atol=5e-2, rtol=5e-2), "bf16 mismatch"

    # 3) Streamed (hidden-tiled) fallback path, f32 accumulating into o_ref.
    out_tiled = jax.block_until_ready(
        position_wise_ffn(x, w1, b1, w2, b2, force_tiled=True))
    assert out_tiled.shape == (batch, seq, ffn_num_outputs)
    assert jnp.allclose(out_tiled, ref, atol=1e-3, rtol=1e-3), "tiled mismatch"

    print("KERNEL_OK")
</pallas_src>

<mosaic_0001>
module attributes {stable_mosaic.version = 11 : i64} {
  func.func @_ffn_resident_kernel(%arg0: i32, %arg1: memref<8x128xf32, #tpu.memory_space<vmem>>, %arg2: memref<128x128xf32, #tpu.memory_space<vmem>>, %arg3: memref<1x128xf32, #tpu.memory_space<vmem>>, %arg4: memref<128x128xf32, #tpu.memory_space<vmem>>, %arg5: memref<1x128xf32, #tpu.memory_space<vmem>>, %arg6: memref<8x128xf32, #tpu.memory_space<vmem>>) attributes {dimension_semantics = [#tpu.dimension_semantics<parallel>], iteration_bounds = array<i64: 2>, scalar_prefetch = 0 : i64, scratch_operands = 0 : i64, tpu.core_type = #tpu.core_type<tc>, window_params = [{transform_indices = @transform_0, window_bounds = array<i64: 8, 128>}, {pipeline_mode = #tpu.pipeline_mode<synchronous>, transform_indices = @transform_1, window_bounds = array<i64: 128, 128>}, {pipeline_mode = #tpu.pipeline_mode<synchronous>, transform_indices = @transform_2, window_bounds = array<i64: 1, 128>}, {pipeline_mode = #tpu.pipeline_mode<synchronous>, transform_indices = @transform_3, window_bounds = array<i64: 128, 128>}, {pipeline_mode = #tpu.pipeline_mode<synchronous>, transform_indices = @transform_4, window_bounds = array<i64: 1, 128>}, {transform_indices = @transform_5, window_bounds = array<i64: 8, 128>}]} {
    %c0 = arith.constant 0 : index
    %c0_0 = arith.constant 0 : index
    %0 = vector.load %arg1[%c0, %c0_0] : memref<8x128xf32, #tpu.memory_space<vmem>>, vector<8x128xf32>
    %c0_1 = arith.constant 0 : index
    %c0_2 = arith.constant 0 : index
    %1 = vector.load %arg2[%c0_1, %c0_2] : memref<128x128xf32, #tpu.memory_space<vmem>>, vector<128x128xf32>
    %cst = arith.constant dense<0.000000e+00> : vector<8x128xf32>
    %2 = tpu.matmul %0, %1, %cst {dimension_numbers = #tpu.dot_dimension_numbers<[1], [0], [0], [1], [0, 0, 1, 1], [], []>} : vector<8x128xf32>, vector<128x128xf32>, vector<8x128xf32> -> vector<8x128xf32>
    %c0_3 = arith.constant 0 : index
    %c0_4 = arith.constant 0 : index
    %3 = vector.load %arg3[%c0_3, %c0_4] : memref<1x128xf32, #tpu.memory_space<vmem>>, vector<1x128xf32>
    %4 = vector.broadcast %3 : vector<1x128xf32> to vector<8x128xf32>
    %5 = arith.addf %2, %4 : vector<8x128xf32>
    %cst_5 = arith.constant 0.000000e+00 : f32
    %6 = vector.broadcast %cst_5 : f32 to vector<8x128xf32>
    %7 = arith.maximumf %5, %6 : vector<8x128xf32>
    %c0_6 = arith.constant 0 : index
    %c0_7 = arith.constant 0 : index
    %8 = vector.load %arg4[%c0_6, %c0_7] : memref<128x128xf32, #tpu.memory_space<vmem>>, vector<128x128xf32>
    %cst_8 = arith.constant dense<0.000000e+00> : vector<8x128xf32>
    %9 = tpu.matmul %7, %8, %cst_8 {dimension_numbers = #tpu.dot_dimension_numbers<[1], [0], [0], [1], [0, 0, 1, 1], [], []>} : vector<8x128xf32>, vector<128x128xf32>, vector<8x128xf32> -> vector<8x128xf32>
    %c0_9 = arith.constant 0 : index
    %c0_10 = arith.constant 0 : index
    %10 = vector.load %arg5[%c0_9, %c0_10] : memref<1x128xf32, #tpu.memory_space<vmem>>, vector<1x128xf32>
    %11 = vector.broadcast %10 : vector<1x128xf32> to vector<8x128xf32>
    %12 = arith.addf %9, %11 : vector<8x128xf32>
    %c0_11 = arith.constant 0 : index
    %c0_12 = arith.constant 0 : index
    %13 = vector.load %arg6[%c0_11, %c0_12] : memref<8x128xf32, #tpu.memory_space<vmem>>, vector<8x128xf32>
    tpu.vector_store %arg6[%c0_11, %c0_12], %12 {strides = array<i32>} : memref<8x128xf32, #tpu.memory_space<vmem>>, vector<8x128xf32>,
    return
  }
  func.func @transform_0(%arg0: i32) -> (i32, i32) {
    %c0_i32 = arith.constant 0 : i32
    %c0_i32_0 = arith.constant 0 : i32
    return %arg0, %c0_i32 : i32, i32
  }
  func.func @transform_1(%arg0: i32) -> (i32, i32) {
    %c0_i32 = arith.constant 0 : i32
    %c0_i32_0 = arith.constant 0 : i32
    %c0_i32_1 = arith.constant 0 : i32
    return %c0_i32, %c0_i32_0 : i32, i32
  }
  func.func @transform_2(%arg0: i32) -> (i32, i32) {
    %c0_i32 = arith.constant 0 : i32
    %c0_i32_0 = arith.constant 0 : i32
    %c0_i32_1 = arith.constant 0 : i32
    return %c0_i32, %c0_i32_0 : i32, i32
  }
  func.func @transform_3(%arg0: i32) -> (i32, i32) {
    %c0_i32 = arith.constant 0 : i32
    %c0_i32_0 = arith.constant 0 : i32
    %c0_i32_1 = arith.constant 0 : i32
    return %c0_i32, %c0_i32_0 : i32, i32
  }
  func.func @transform_4(%arg0: i32) -> (i32, i32) {
    %c0_i32 = arith.constant 0 : i32
    %c0_i32_0 = arith.constant 0 : i32
    %c0_i32_1 = arith.constant 0 : i32
    return %c0_i32, %c0_i32_0 : i32, i32
  }
  func.func @transform_5(%arg0: i32) -> (i32, i32) {
    %c0_i32 = arith.constant 0 : i32
    %c0_i32_0 = arith.constant 0 : i32
    return %arg0, %c0_i32 : i32, i32
  }
}

</mosaic_0001>

<bundles_post_ra>
// kernel: position_wise_ffn.1
= control target key start
LH: loop header
LB: loop body
LE: loop exit
PB: predicated region body
PF: predicated region fallthrough
CT: control target
= control target key end

     0   :  { %s627_s18 = smov 0   ;;  %s791_s0 = inlined_call_operand.vmem [shape: f32[16,128], index: 0, kind: input, shape index: {}]   ;;  %s792_s1 = inlined_call_operand.vmem [shape: f32[128,128], index: 1, kind: input, shape index: {}]   ;;  %s793_s2 = inlined_call_operand.vmem [shape: f32[1,128], index: 2, kind: input, shape index: {}]   ;;  %s794_s3 = inlined_call_operand.vmem [shape: f32[128,128], index: 3, kind: input, shape index: {}]   ;;  %s795_s4 = inlined_call_operand.vmem [shape: f32[1,128], index: 4, kind: input, shape index: {}]   ;;  %s796_s5 = inlined_call_operand.vmem [shape: f32[16,128], index: 5, kind: output, shape index: {}]  }
   0x1 LB: > { %s462_s19 = sadd.s32 4294967295, %s593_s18   ;;  %p466_p0 = scmp.ge.s32.totalorder %s593_s18, 1  ;;  %s593_s18 = sphi %s627_s18, %s15_s18  }
   0x2   : > { %p186_p1 = scmp.lt.s32.totalorder %s593_s18, 3 }
   0x4   : > { %p187_p2 = pnand %p466_p0, %p186_p1 }
   0x5   : > { %p212_p3 = scmp.lt.s32.totalorder (!%p187_p2), %s462_s19, 1 }
   0x6   : > { %190 = sbr.rel (%p187_p2) target bundleno = 437 (0x1b5), region = 40 }
   0xb   : > { %v236_v0 = vld [vmem:[%s792_s1 + $0x78] sm:$0xff]  ;;  %v595_v1 = vmov 0.0   ;;  %v235_v2 = vld [vmem:[%s792_s1 + $0x70] sm:$0xff]  ;;  %vm596_vm0 = vmmov 0   ;;  %v234_v3 = vld [vmem:[%s792_s1 + $0x68] sm:$0xff]  ;;  %s798_s19 = smov (!%p212_p3, %s462_s19), 1 }
   0xc   : > { %507 = vmatprep.subr.mxu0 %v595_v1  ;;  %539 = vmatprep.mubr.msk.f32.mxu0 %vm596_vm0, %v595_v1  ;;  %v233_v4 = vld [vmem:[%s792_s1 + $0x60] sm:$0xff]  ;;  %v330_v5 = vld [vmem:[%s794_s3 + $0x78] sm:$0xff]  ;;  %v329_v6 = vld [vmem:[%s794_s3 + $0x70] sm:$0xff]  ;;  %s467_s22 = sshll.u32 %s798_s19, 3 }
   0xd   : > { %508 = vmatpush3.msra.mxu0 %v236_v0  ;;  %542 = vmatprep.subr.mxu1 %v595_v1  ;;  %v232_v7 = vld [vmem:[%s792_s1 + $0x58] sm:$0xff]  ;;  %v328_v8 = vld [vmem:[%s794_s3 + $0x68] sm:$0xff]  ;;  %v231_v9 = vld [vmem:[%s792_s1 + $0x50] sm:$0xff]  ;;  %s215_s6 = scalar_lea.vmem %s791_s0, %s467_s22  ;;  %s219_s26 = scalar_lea.vmem %s796_s5, %s467_s22 }
   0xe   : > { %509 = vmatprep.subr.mxu0 %v595_v1  ;;  %574 = vmatprep.mubr.msk.f32.mxu1 %vm596_vm0, %v595_v1  ;;  %v327_v10 = vld [vmem:[%s794_s3 + $0x60] sm:$0xff]  ;;  %v230_v11 = vld [vmem:[%s792_s1 + $0x48] sm:$0xff]  ;;  %v326_v12 = vld [vmem:[%s794_s3 + $0x58] sm:$0xff] }
   0xf   : > { %510 = vmatpush3.msra.mxu0 %v235_v2  ;;  %543 = vmatpush3.msra.mxu1 %v330_v5  ;;  %v229_v13 = vld [vmem:[%s792_s1 + $0x40] sm:$0xff]  ;;  %v325_v14 = vld [vmem:[%s794_s3 + $0x50] sm:$0xff]  ;;  %v228_v15 = vld [vmem:[%s792_s1 + $0x38] sm:$0xff] }
  0x10   : > { %511 = vmatprep.subr.mxu0 %v595_v1  ;;  %544 = vmatprep.subr.mxu1 %v595_v1  ;;  %v324_v16 = vld [vmem:[%s794_s3 + $0x48] sm:$0xff]  ;;  %v227_v17 = vld [vmem:[%s792_s1 + $0x30] sm:$0xff]  ;;  %v323_v18 = vld [vmem:[%s794_s3 + $0x40] sm:$0xff] }
  0x11   : > { %512 = vmatpush3.msra.mxu0 %v234_v3  ;;  %545 = vmatpush3.msra.mxu1 %v329_v6  ;;  %v226_v19 = vld [vmem:[%s792_s1 + $0x28] sm:$0xff]  ;;  %v322_v20 = vld [vmem:[%s794_s3 + $0x38] sm:$0xff]  ;;  %v225_v21 = vld [vmem:[%s792_s1 + $0x20] sm:$0xff] }
  0x12   : > { %513 = vmatprep.subr.mxu0 %v595_v1  ;;  %546 = vmatprep.subr.mxu1 %v595_v1  ;;  %v321_v22 = vld [vmem:[%s794_s3 + $0x30] sm:$0xff]  ;;  %v224_v23 = vld [vmem:[%s792_s1 + $0x18] sm:$0xff]  ;;  %v320_v24 = vld [vmem:[%s794_s3 + $0x28] sm:$0xff] }
  0x13   : > { %514 = vmatpush3.msra.mxu0 %v233_v4  ;;  %547 = vmatpush3.msra.mxu1 %v328_v8  ;;  %v223_v25 = vld [vmem:[%s792_s1 + $0x10] sm:$0xff]  ;;  %v319_v26 = vld [vmem:[%s794_s3 + $0x20] sm:$0xff]  ;;  %v222_v27 = vld [vmem:[%s792_s1 + $0x8] sm:$0xff] }
  0x14   : > { %515 = vmatprep.subr.mxu0 %v595_v1  ;;  %548 = vmatprep.subr.mxu1 %v595_v1  ;;  %v318_v28 = vld [vmem:[%s794_s3 + $0x18] sm:$0xff]  ;;  %v221_v29 = vld [vmem:[%s792_s1] sm:$0xff]  ;;  %v317_v31 = vld [vmem:[%s794_s3 + $0x10] sm:$0xff] }
  0x15   : > { %516 = vmatpush3.msra.mxu0 %v232_v7  ;;  %549 = vmatpush3.msra.mxu1 %v327_v10  ;;  %v220_v30 = vld [vmem:[%s215_s6] sm:$0xff]  ;;  %v316_v32 = vld [vmem:[%s794_s3 + $0x8] sm:$0xff] }
  0x16   : > { %517 = vmatprep.subr.mxu0 %v595_v1  ;;  %550 = vmatprep.subr.mxu1 %v595_v1  ;;  %v315_v33 = vld [vmem:[%s794_s3] sm:$0xff] }
  0x17   : > { %518 = vmatpush3.msra.mxu0 %v231_v9  ;;  %551 = vmatpush3.msra.mxu1 %v326_v12  ;;  %v469_v34 = vld [vmem:[%s793_s2] ss:$0 sm:$0xff] }
  0x18   : > { %519 = vmatprep.subr.mxu0 %v595_v1  ;;  %552 = vmatprep.subr.mxu1 %v595_v1  ;;  %v470_v39 = vld [vmem:[%s795_s4] ss:$0 sm:$0xff] }
  0x19   : > { %520 = vmatpush3.msra.mxu0 %v230_v11  ;;  %553 = vmatpush3.msra.mxu1 %v325_v14 }
  0x1a   : > { %521 = vmatprep.subr.mxu0 %v595_v1  ;;  %554 = vmatprep.subr.mxu1 %v595_v1 }
  0x1b   : > { %522 = vmatpush3.msra.mxu0 %v229_v13  ;;  %555 = vmatpush3.msra.mxu1 %v324_v16 }
  0x1c   : > { %523 = vmatprep.subr.mxu0 %v595_v1  ;;  %556 = vmatprep.subr.mxu1 %v595_v1 }
  0x1d   : > { %524 = vmatpush3.msra.mxu0 %v228_v15  ;;  %557 = vmatpush3.msra.mxu1 %v323_v18 }
  0x1e   : > { %525 = vmatprep.subr.mxu0 %v595_v1  ;;  %558 = vmatprep.subr.mxu1 %v595_v1 }
  0x1f   : > { %526 = vmatpush3.msra.mxu0 %v227_v17  ;;  %559 = vmatpush3.msra.mxu1 %v322_v20 }
  0x20   : > { %527 = vmatprep.subr.mxu0 %v595_v1  ;;  %560 = vmatprep.subr.mxu1 %v595_v1 }
  0x21   : > { %528 = vmatpush3.msra.mxu0 %v226_v19  ;;  %561 = vmatpush3.msra.mxu1 %v321_v22 }
  0x22   : > { %529 = vmatprep.subr.mxu0 %v595_v1  ;;  %562 = vmatprep.subr.mxu1 %v595_v1 }
  0x23   : > { %530 = vmatpush3.msra.mxu0 %v225_v21  ;;  %563 = vmatpush3.msra.mxu1 %v320_v24 }
  0x24   : > { %531 = vmatprep.subr.mxu0 %v595_v1  ;;  %564 = vmatprep.subr.mxu1 %v595_v1 }
  0x25   : > { %532 = vmatpush3.msra.mxu0 %v224_v23  ;;  %565 = vmatpush3.msra.mxu1 %v319_v26 }
  0x26   : > { %533 = vmatprep.subr.mxu0 %v595_v1  ;;  %566 = vmatprep.subr.mxu1 %v595_v1 }
  0x27   : > { %534 = vmatpush3.msra.mxu0 %v223_v25  ;;  %567 = vmatpush3.msra.mxu1 %v318_v28 }
  0x28   : > { %535 = vmatprep.subr.mxu0 %v595_v1  ;;  %568 = vmatprep.subr.mxu1 %v595_v1 }
  0x29   : > { %536 = vmatpush3.msra.mxu0 %v222_v27  ;;  %569 = vmatpush3.msra.mxu1 %v317_v31 }
  0x2a   : > { %537 = vmatprep.subr.mxu0 %v595_v1  ;;  %570 = vmatprep.subr.mxu1 %v595_v1 }
  0x2b   : > { %538 = vmatpush3.msra.mxu0 %v221_v29  ;;  %571 = vmatpush3.msra.mxu1 %v316_v32 }
  0x2c   : > { %540 = vmatmul.mubr.f32.vlgmr.msra.gmra.mxu0 %v220_v30  ;;  %572 = vmatprep.subr.mxu1 %v595_v1 }
  0x2d   : > { %573 = vmatpush3.msra.mxu1 %v315_v33 }
  0xec   : > { %v310_v35 = vpop.f32.mrf.mxu0 }
  0xed   : > { %v311_v36 = vadd.f32 %v469_v34, %v310_v35 }
  0xee   : > { %v541_v37 = vpop.f32.mrf.mxu0 }
  0xef   : > { %v314_v38 = vmax.f32 %v311_v36, 0.0 }
  0xf1   : > { %575 = vmatmul.mubr.f32.vlgmr.msra.gmra.mxu1 %v314_v38 }
 0x1b1   : > { %v404_v40 = vpop.f32.mrf.mxu1 }
 0x1b2   : > { %v405_v41 = vadd.f32 %v470_v39, %v404_v40 }
 0x1b3   : > { %v576_v42 = vpop.f32.mrf.mxu1 }
 0x1b4   : > { %408 = vst [vmem:[%s219_s26] sm:$0xff] %v405_v41 }
 0x1b5 PF: > { %s15_s18 = sadd.s32 1, %s593_s18  }
 0x1b6   : > { %p12_p4 = scmp.ge.s32.totalorder %s15_s18, 4  }
 0x1b8   :  { %14 = sbr.rel (!%p12_p4) target bundleno = 1 (0x1), region = 70 }

</bundles_post_ra>
